<compile_context>
chip_gen: v7x
topology: tpu7x:2x2x1
jax: 0.10.0
libtpu: 0.0.40
codegen_flags: <defaults>
</compile_context>

<pallas_src>
import functools
import math

import jax
import jax.numpy as jnp
from jax import lax
from jax.experimental import pallas as pl
from jax.experimental.pallas import tpu as pltpu

EPS = 1e-5                      # PyTorch nn.LayerNorm default eps
SEQ_TILE_CAP = 256              # q / kv tile cap (fills the 256-wide MXU on v6e/v7x)
ROW_TILE_CAP = 256              # row tile for the fused QKV projection
PROJ_M_CAP, PROJ_N_CAP = 512, 512
VMEM_LIMIT = 64 * 1024 * 1024   # explicit scoped-VMEM cap; <= physical on v5e..v7x


# ------------------------------------------------------------------
# Tiling helpers
# ------------------------------------------------------------------
def _round_up(n, m):
    return ((n + m - 1) // m) * m


def _pick_tile(n, cap, mult):
    """Tile for an axis of length n: the full axis if n <= cap (full-size
    blocks are exempt from the (8,128) rule), else the largest divisor of n
    that is <= cap and a multiple of `mult`.  Falls back to n (full axis) if
    no such divisor exists -- callers pad the axis beforehand when that would
    be harmful (sequence / vocab padding below)."""
    if n <= cap:
        return n
    t = (cap // mult) * mult
    while t >= mult:
        if n % t == 0:
            return t
        t -= mult
    return n


def _const_index_map(grid_rank, block_rank):
    zeros = (0,) * block_rank
    if grid_rank == 1:
        return lambda i: zeros
    if grid_rank == 2:
        return lambda i, j: zeros
    if grid_rank == 3:
        return lambda i, j, k: zeros
    return lambda *idx: zeros


@functools.lru_cache(maxsize=None)
def _buffered_single_ok():
    """Probe whether pipeline_mode=pl.Buffered(1) lowers on this JAX/Mosaic.
    Single-buffering grid-invariant weight blocks halves their VMEM footprint
    (there is nothing to prefetch for a constant index map); fall back to the
    default double-buffered spec if unsupported."""
    if not hasattr(pl, "Buffered"):
        return False
    try:
        def _probe(x_ref, w_ref, o_ref):
            o_ref[...] = x_ref[...] + w_ref[...]

        f = pl.pallas_call(
            _probe,
            grid=(2,),
            in_specs=[pl.BlockSpec((8, 128), lambda i: (i, 0)),
                      pl.BlockSpec((8, 128), lambda i: (0, 0),
                                   pipeline_mode=pl.Buffered(1))],
            out_specs=pl.BlockSpec((8, 128), lambda i: (i, 0)),
            out_shape=jax.ShapeDtypeStruct((16, 128), jnp.float32))
        jax.block_until_ready(f(jnp.zeros((16, 128), jnp.float32),
                                jnp.ones((16, 128), jnp.float32)))
        return True
    except Exception:
        return False


def _invariant_spec(shape, grid_rank):
    """BlockSpec for a grid-invariant (weight) operand: full block, constant
    index map, single-buffered when supported."""
    imap = _const_index_map(grid_rank, len(shape))
    if _buffered_single_ok():
        return pl.BlockSpec(shape, imap, pipeline_mode=pl.Buffered(1))
    return pl.BlockSpec(shape, imap)


def _layer_norm(x, gamma, beta):
    mu = jnp.mean(x, axis=-1, keepdims=True)
    xc = x - mu
    var = jnp.mean(xc * xc, axis=-1, keepdims=True)
    return xc * lax.rsqrt(var + EPS) * gamma + beta


# ------------------------------------------------------------------
# Kernel 1: fused Q/K/V projection (one bf16 matmul per row tile)
# ------------------------------------------------------------------
def _qkv_kernel(x_ref, w_ref, b_ref, q_ref, k_ref, v_ref):
    d = q_ref.shape[-1]
    x_b = x_ref[...].astype(jnp.bfloat16)
    qkv = jnp.dot(x_b, w_ref[...], preferred_element_type=jnp.float32) + b_ref[...]
    qkv = qkv.astype(jnp.bfloat16)
    q_ref[...] = qkv[:, :d]
    k_ref[...] = qkv[:, d:2 * d]
    v_ref[...] = qkv[:, 2 * d:]


def qkv_projection(x2d, wqkv, bqkv):
    """Precompute bf16 Q/K/V once per layer: removes the per-(q-tile, kv-tile)
    projection recompute inside the attention grid and halves the dominant
    HBM kv stream (bf16 q/k/v vs re-reading the f32 residual stream)."""
    M, D = x2d.shape
    tm = _pick_tile(M, ROW_TILE_CAP, 8)
    row_spec = pl.BlockSpec((tm, D), lambda i: (i, 0))
    qkv_shape = jax.ShapeDtypeStruct((M, D), jnp.bfloat16)
    return pl.pallas_call(
        _qkv_kernel,
        grid=(M // tm,),
        in_specs=[pl.BlockSpec((tm, D), lambda i: (i, 0)),
                  _invariant_spec(wqkv.shape, 1),
                  _invariant_spec(bqkv.shape, 1)],
        out_specs=(row_spec, row_spec, row_spec),
        out_shape=(qkv_shape, qkv_shape, qkv_shape),
        compiler_params=pltpu.CompilerParams(
            dimension_semantics=("parallel",),
            vmem_limit_bytes=VMEM_LIMIT),
    )(x2d, wqkv, bqkv)


# ------------------------------------------------------------------
# Kernel 2: flash-style attention + out-proj + residual/LN1 + FFN + residual/LN2
#   grid = (B, num_q_tiles, num_kv_tiles); online softmax over the kv axis.
# ------------------------------------------------------------------
def make_layer_kernel(num_heads, head_dim, tq, tk, valid_len, seq_pad):
    H, hd = num_heads, head_dim
    scale = 1.0 / math.sqrt(hd)
    masked = valid_len < seq_pad          # static: only when sequence was padded

    def layer_kernel(x_ref, q_ref, k_ref, v_ref,
                     wo_ref, bo_ref, w1_ref, b1_ref, w2_ref, b2_ref,
                     g1_ref, be1_ref, g2_ref, be2_ref,
                     out_ref,
                     m_sc, l_sc, acc_sc):
        ki = pl.program_id(2)
        nkv = pl.num_programs(2)

        @pl.when(ki == 0)
        def _init():
            m_sc[...] = jnp.full(m_sc.shape, -jnp.inf, dtype=m_sc.dtype)
            l_sc[...] = jnp.zeros(l_sc.shape, dtype=l_sc.dtype)
            acc_sc[...] = jnp.zeros(acc_sc.shape, dtype=acc_sc.dtype)

        q_b = q_ref[0]                    # (tq, D) bf16, precomputed
        k_b = k_ref[0]                    # (tk, D) bf16, precomputed
        v_b = v_ref[0]                    # (tk, D) bf16, precomputed

        # Per-head online softmax over this kv block; no (S,S) tensor and no
        # causal mask (mirrors the reference module's mask=None default path).
        for h in range(H):                # static unroll, H is small
            sl = slice(h * hd, (h + 1) * hd)
            s = lax.dot_general(q_b[:, sl], k_b[:, sl],
                                (((1,), (1,)), ((), ())),
                                preferred_element_type=jnp.float32) * scale
            if masked:                    # mask padded KEY positions only
                col = lax.broadcasted_iota(jnp.int32, (tq, tk), 1) + ki * tk
                s = jnp.where(col < valid_len, s, -1e30)
            m_prev = m_sc[h]                                           # (tq, 1)
            m_new = jnp.maximum(m_prev, jnp.max(s, axis=-1, keepdims=True))
            alpha = jnp.exp(m_prev - m_new)
            # TODO(synk): bf16 exp here on v6e/v7x (keep f32 on v5e's EUP).
            p = jnp.exp(s - m_new)
            l_sc[h] = alpha * l_sc[h] + jnp.sum(p, axis=-1, keepdims=True)
            acc_sc[:, sl] = alpha * acc_sc[:, sl] + jnp.dot(
                p.astype(jnp.bfloat16), v_b[:, sl],
                preferred_element_type=jnp.float32)
            m_sc[h] = m_new

        @pl.when(ki == nkv - 1)
        def _finalize():
            # Normalize in place: acc_sc already holds the head-concatenated
            # (tq, D) context in lane-dense layout (no extra staging buffer).
            for h in range(H):
                sl = slice(h * hd, (h + 1) * hd)
                acc_sc[:, sl] = acc_sc[:, sl] / l_sc[h]   # exact; epilogue-only

            xq = x_ref[0]                                 # (tq, D) f32 residual
            attn = jnp.dot(acc_sc[...].astype(jnp.bfloat16), wo_ref[...],
                           preferred_element_type=jnp.float32) + bo_ref[...]
            x1 = _layer_norm(xq + attn, g1_ref[...], be1_ref[...])

            # TODO(synk): tile w1/w2 over d_ff (extra grid axis / emit_pipeline)
            # for very large d_ff on v7x's 64 MiB VMEM.
            h1 = jnp.maximum(
                jnp.dot(x1.astype(jnp.bfloat16), w1_ref[...],
                        preferred_element_type=jnp.float32) + b1_ref[...], 0.0)
            ff = jnp.dot(h1.astype(jnp.bfloat16), w2_ref[...],
                         preferred_element_type=jnp.float32) + b2_ref[...]
            out_ref[0] = _layer_norm(x1 + ff, g2_ref[...], be2_ref[...])

    return layer_kernel


def attention_ffn_layer(x, q, k, v, lp, *, num_heads, valid_len):
    B, S_pad, D = x.shape
    H = num_heads
    hd = D // H
    tq = _pick_tile(S_pad, SEQ_TILE_CAP, 8)
    tk = _pick_tile(S_pad, SEQ_TILE_CAP, 8)
    nq, nkv = S_pad // tq, S_pad // tk
    kernel = make_layer_kernel(H, hd, tq, tk, valid_len, S_pad)

    weights = (lp["wo"], lp["bo"], lp["w1"], lp["b1"], lp["w2"], lp["b2"],
               lp["g1"], lp["be1"], lp["g2"], lp["be2"])

    q_spec = pl.BlockSpec((1, tq, D), lambda b, qi, ki: (b, qi, 0))
    kv_spec = pl.BlockSpec((1, tk, D), lambda b, qi, ki: (b, ki, 0))
    in_specs = ([q_spec, q_spec, kv_spec, kv_spec]
                + [_invariant_spec(w.shape, 3) for w in weights])

    # TODO(synk): optionally store the residual stream in bf16 between layers
    # on v5e (halves activation HBM traffic); kept f32 here for accuracy.
    return pl.pallas_call(
        kernel,
        grid=(B, nq, nkv),
        in_specs=in_specs,
        out_specs=pl.BlockSpec((1, tq, D), lambda b, qi, ki: (b, qi, 0)),
        out_shape=jax.ShapeDtypeStruct((B, S_pad, D), jnp.float32),
        scratch_shapes=[
            # TODO(synk): (H, tq, 1) pads to 128 lanes; pack lane-dense if this
            # ever becomes a VMEM/masked-store bottleneck.
            pltpu.VMEM((H, tq, 1), jnp.float32),   # running max m
            pltpu.VMEM((H, tq, 1), jnp.float32),   # running sum l
            pltpu.VMEM((tq, D), jnp.float32),      # lane-dense context accumulator
        ],
        compiler_params=pltpu.CompilerParams(
            dimension_semantics=("parallel", "parallel", "arbitrary"),
            vmem_limit_bytes=VMEM_LIMIT),
    )(x, q, k, v, *weights)


# ------------------------------------------------------------------
# Kernel 3: final output projection, gridded over (row tiles, vocab tiles)
# ------------------------------------------------------------------
def _proj_kernel(x_ref, w_ref, b_ref, o_ref):
    o_ref[...] = (jnp.dot(x_ref[...].astype(jnp.bfloat16), w_ref[...],
                          preferred_element_type=jnp.float32) + b_ref[...])


def output_projection(x2d, w, b):
    M, D = x2d.shape
    V = w.shape[1]
    tn = _pick_tile(V, PROJ_N_CAP, 128)
    if tn > PROJ_N_CAP:            # no lane-aligned divisor: pad vocab, slice after
        V_pad = _round_up(V, 128)
        w = jnp.pad(w, ((0, 0), (0, V_pad - V)))
        b = jnp.pad(b, ((0, 0), (0, V_pad - V)))
        tn = _pick_tile(V_pad, PROJ_N_CAP, 128)
    else:
        V_pad = V
    tm = _pick_tile(M, PROJ_M_CAP, 8)
    out = pl.pallas_call(
        _proj_kernel,
        grid=(M // tm, V_pad // tn),
        in_specs=[pl.BlockSpec((tm, D), lambda i, j: (i, 0)),
                  pl.BlockSpec((D, tn), lambda i, j: (0, j)),
                  pl.BlockSpec((1, tn), lambda i, j: (0, j))],
        out_specs=pl.BlockSpec((tm, tn), lambda i, j: (i, j)),
        out_shape=jax.ShapeDtypeStruct((M, V_pad), jnp.float32),
        compiler_params=pltpu.CompilerParams(
            dimension_semantics=("parallel", "parallel"),
            vmem_limit_bytes=VMEM_LIMIT),
    )(x2d, w, b)
    return out[:, :V] if V_pad != V else out


# ------------------------------------------------------------------
# Full forward pass
# ------------------------------------------------------------------
def forward(tokens, params):
    B, S = tokens.shape
    D = params["emb"].shape[1]
    H = params["num_heads"]

    # Embedding gather * sqrt(D) + sinusoidal PE (plain JAX; XLA fuses the
    # elementwise ops into the gather -- no extra HBM round trip).
    x = (params["emb"][tokens] * math.sqrt(D)
         + params["pe"][:S][None, :, :]).astype(jnp.float32)

    # Pad the sequence so tiles satisfy the (8,128) rule; padded key positions
    # are masked inside the attention kernel, padded rows sliced off at the end.
    S_pad = S if S <= SEQ_TILE_CAP else _round_up(S, 128)
    if S_pad != S:
        x = jnp.pad(x, ((0, 0), (0, S_pad - S), (0, 0)))

    for lp in params["layers"]:
        q, k, v = qkv_projection(x.reshape(B * S_pad, D), lp["wqkv"], lp["bqkv"])
        x = attention_ffn_layer(
            x,
            q.reshape(B, S_pad, D), k.reshape(B, S_pad, D), v.reshape(B, S_pad, D),
            lp, num_heads=H, valid_len=S)

    logits = output_projection(x.reshape(B * S_pad, D),
                               params["w_out"], params["b_out"])
    return logits.reshape(B, S_pad, -1)[:, :S, :]


# ------------------------------------------------------------------
# Pure-JAX reference (same bf16-stored weights, f32 math) for validation.
# ------------------------------------------------------------------
def forward_reference(tokens, params):
    B, S = tokens.shape
    D = params["emb"].shape[1]
    H = params["num_heads"]
    hd = D // H
    x = params["emb"][tokens] * math.sqrt(D) + params["pe"][:S][None]
    for lp in params["layers"]:
        qkv = x @ lp["wqkv"].astype(jnp.float32) + lp["bqkv"]
        q, k, v = jnp.split(qkv, 3, axis=-1)
        q = q.reshape(B, S, H, hd).transpose(0, 2, 1, 3)
        k = k.reshape(B, S, H, hd).transpose(0, 2, 1, 3)
        v = v.reshape(B, S, H, hd).transpose(0, 2, 1, 3)
        s = (q @ k.transpose(0, 1, 3, 2)) / math.sqrt(hd)
        p = jax.nn.softmax(s, axis=-1)
        ctx = (p @ v).transpose(0, 2, 1, 3).reshape(B, S, D)
        attn = ctx @ lp["wo"].astype(jnp.float32) + lp["bo"]
        x = _layer_norm(x + attn, lp["g1"], lp["be1"])
        h1 = jax.nn.relu(x @ lp["w1"].astype(jnp.float32) + lp["b1"])
        ff = h1 @ lp["w2"].astype(jnp.float32) + lp["b2"]
        x = _layer_norm(x + ff, lp["g2"], lp["be2"])
    return x @ params["w_out"].astype(jnp.float32) + params["b_out"]


# ------------------------------------------------------------------
# Deterministic parameter init (synthetic; mirrors module shapes).
# Linear weights stored as (in, out); matmul weights kept in bf16.
# ------------------------------------------------------------------
def init_params(key, vocab, D, H, F, L, max_len):
    def xavier(k, shape):
        fan_in, fan_out = shape[-2], shape[-1]
        a = math.sqrt(6.0 / (fan_in + fan_out))
        return jax.random.uniform(k, shape, jnp.float32, -a, a)

    def bias(k, n, fan_in):
        b = 1.0 / math.sqrt(fan_in)
        return jax.random.uniform(k, (n,), jnp.float32, -b, b)

    keys = jax.random.split(key, 3 + L)
    params = {"num_heads": H}
    params["emb"] = xavier(keys[0], (vocab, D))

    # sinusoidal positional encoding (sin at even cols, cos at odd cols)
    pos = jnp.arange(max_len, dtype=jnp.float32)[:, None]
    div = jnp.exp(jnp.arange(0, D, 2, dtype=jnp.float32) * (-math.log(10000.0) / D))
    params["pe"] = jnp.stack([jnp.sin(pos * div), jnp.cos(pos * div)],
                             axis=-1).reshape(max_len, D)

    layers = []
    for l in range(L):
        lk = jax.random.split(keys[3 + l], 12)
        wq = xavier(lk[0], (D, D))
        wk = xavier(lk[1], (D, D))
        wv = xavier(lk[2], (D, D))
        bq = bias(lk[4], D, D)
        bk = bias(lk[5], D, D)
        bv = bias(lk[6], D, D)
        layers.append({
            "wqkv": jnp.concatenate([wq, wk, wv], axis=1).astype(jnp.bfloat16),
            "bqkv": jnp.concatenate([bq, bk, bv]).reshape(1, 3 * D),
            "wo": xavier(lk[3], (D, D)).astype(jnp.bfloat16),
            "bo": bias(lk[7], D, D).reshape(1, D),
            "w1": xavier(lk[8], (D, F)).astype(jnp.bfloat16),
            "b1": bias(lk[9], F, D).reshape(1, F),
            "w2": xavier(lk[10], (F, D)).astype(jnp.bfloat16),
            "b2": bias(lk[11], D, F).reshape(1, D),
            "g1": jnp.ones((1, D), jnp.float32), "be1": jnp.zeros((1, D), jnp.float32),
            "g2": jnp.ones((1, D), jnp.float32), "be2": jnp.zeros((1, D), jnp.float32),
        })
    params["layers"] = layers
    params["w_out"] = xavier(keys[1], (D, vocab)).astype(jnp.bfloat16)
    params["b_out"] = bias(keys[2], vocab, D).reshape(1, vocab)
    return params


if __name__ == "__main__":
    B, S = 2, 8
    VOCAB, D_MODEL, N_HEADS, D_FF, N_LAYERS = 128, 32, 4, 64, 2
    MAX_LEN = 64

    key = jax.random.PRNGKey(0)
    pkey, tkey = jax.random.split(key)
    params = init_params(pkey, VOCAB, D_MODEL, N_HEADS, D_FF, N_LAYERS, MAX_LEN)
    tokens = jax.random.randint(tkey, (B, S), 0, VOCAB)

    logits = forward(tokens, params)
    jax.block_until_ready(logits)
    assert logits.shape == (B, S, VOCAB)
    assert bool(jnp.all(jnp.isfinite(logits)))

    ref = forward_reference(tokens, params)
    err = float(jnp.max(jnp.abs(logits - ref)))
    assert err < 5e-2, f"mismatch vs JAX reference: max abs err = {err}"
    print("KERNEL_OK")
</pallas_src>

<mosaic_0001>
module attributes {stable_mosaic.version = 11 : i64} {
  func.func @_probe(%arg0: i32, %arg1: memref<8x128xf32, #tpu.memory_space<vmem>>, %arg2: memref<8x128xf32, #tpu.memory_space<vmem>>, %arg3: memref<8x128xf32, #tpu.memory_space<vmem>>) attributes {dimension_semantics = [#tpu.dimension_semantics<arbitrary>], iteration_bounds = array<i64: 2>, scalar_prefetch = 0 : i64, scratch_operands = 0 : i64, tpu.core_type = #tpu.core_type<tc>, window_params = [{transform_indices = @transform_0, window_bounds = array<i64: 8, 128>}, {pipeline_mode = #tpu.pipeline_mode<synchronous>, transform_indices = @transform_1, window_bounds = array<i64: 8, 128>}, {transform_indices = @transform_2, window_bounds = array<i64: 8, 128>}]} {
    %c0 = arith.constant 0 : index
    %c0_0 = arith.constant 0 : index
    %0 = vector.load %arg1[%c0, %c0_0] : memref<8x128xf32, #tpu.memory_space<vmem>>, vector<8x128xf32>
    %c0_1 = arith.constant 0 : index
    %c0_2 = arith.constant 0 : index
    %1 = vector.load %arg2[%c0_1, %c0_2] : memref<8x128xf32, #tpu.memory_space<vmem>>, vector<8x128xf32>
    %2 = arith.addf %0, %1 : vector<8x128xf32>
    %c0_3 = arith.constant 0 : index
    %c0_4 = arith.constant 0 : index
    %3 = vector.load %arg3[%c0_3, %c0_4] : memref<8x128xf32, #tpu.memory_space<vmem>>, vector<8x128xf32>
    tpu.vector_store %arg3[%c0_3, %c0_4], %2 {strides = array<i32>} : memref<8x128xf32, #tpu.memory_space<vmem>>, vector<8x128xf32>,
    return
  }
  func.func @transform_0(%arg0: i32) -> (i32, i32) {
    %c0_i32 = arith.constant 0 : i32
    %c0_i32_0 = arith.constant 0 : i32
    return %arg0, %c0_i32 : i32, i32
  }
  func.func @transform_1(%arg0: i32) -> (i32, i32) {
    %c0_i32 = arith.constant 0 : i32
    %c0_i32_0 = arith.constant 0 : i32
    %c0_i32_1 = arith.constant 0 : i32
    return %c0_i32, %c0_i32_0 : i32, i32
  }
  func.func @transform_2(%arg0: i32) -> (i32, i32) {
    %c0_i32 = arith.constant 0 : i32
    %c0_i32_0 = arith.constant 0 : i32
    return %arg0, %c0_i32 : i32, i32
  }
}

module attributes {stable_mosaic.version = 11 : i64} {
  func.func @_qkv_kernel(%arg0: i32, %arg1: memref<16x32xf32, #tpu.memory_space<vmem>>, %arg2: memref<32x96xbf16, #tpu.memory_space<vmem>>, %arg3: memref<1x96xf32, #tpu.memory_space<vmem>>, %arg4: memref<16x32xbf16, #tpu.memory_space<vmem>>, %arg5: memref<16x32xbf16, #tpu.memory_space<vmem>>, %arg6: memref<16x32xbf16, #tpu.memory_space<vmem>>) attributes {dimension_semantics = [#tpu.dimension_semantics<parallel>], iteration_bounds = array<i64: 1>, scalar_prefetch = 0 : i64, scratch_operands = 0 : i64, tpu.core_type = #tpu.core_type<tc>, window_params = [{transform_indices = @transform_0, window_bounds = array<i64: 16, 32>}, {pipeline_mode = #tpu.pipeline_mode<synchronous>, transform_indices = @transform_1, window_bounds = array<i64: 32, 96>}, {pipeline_mode = #tpu.pipeline_mode<synchronous>, transform_indices = @transform_2, window_bounds = array<i64: 1, 96>}, {transform_indices = @transform_3, window_bounds = array<i64: 16, 32>}, {transform_indices = @transform_4, window_bounds = array<i64: 16, 32>}, {transform_indices = @transform_5, window_bounds = array<i64: 16, 32>}]} {
    %c0 = arith.constant 0 : index
    %c0_0 = arith.constant 0 : index
    %0 = vector.load %arg1[%c0, %c0_0] : memref<16x32xf32, #tpu.memory_space<vmem>>, vector<16x32xf32>
    %1 = arith.truncf %0 : vector<16x32xf32> to vector<16x32xbf16>
    %c0_1 = arith.constant 0 : index
    %c0_2 = arith.constant 0 : index
    %2 = vector.load %arg2[%c0_1, %c0_2] : memref<32x96xbf16, #tpu.memory_space<vmem>>, vector<32x96xbf16>
    %cst = arith.constant dense<0.000000e+00> : vector<16x96xf32>
    %3 = tpu.matmul %1, %2, %cst {dimension_numbers = #tpu.dot_dimension_numbers<[1], [0], [0], [1], [0, 0, 1, 1], [], []>} : vector<16x32xbf16>, vector<32x96xbf16>, vector<16x96xf32> -> vector<16x96xf32>
    %c0_3 = arith.constant 0 : index
    %c0_4 = arith.constant 0 : index
    %4 = vector.load %arg3[%c0_3, %c0_4] : memref<1x96xf32, #tpu.memory_space<vmem>>, vector<1x96xf32>
    %5 = vector.broadcast %4 : vector<1x96xf32> to vector<16x96xf32>
    %6 = arith.addf %3, %5 : vector<16x96xf32>
    %7 = arith.truncf %6 : vector<16x96xf32> to vector<16x96xbf16>
    %8 = vector.extract_strided_slice %7 {offsets = [0, 0], sizes = [16, 32], strides = [1, 1]} : vector<16x96xbf16> to vector<16x32xbf16>
    %c0_5 = arith.constant 0 : index
    %c0_6 = arith.constant 0 : index
    %9 = vector.load %arg4[%c0_5, %c0_6] : memref<16x32xbf16, #tpu.memory_space<vmem>>, vector<16x32xbf16>
    tpu.vector_store %arg4[%c0_5, %c0_6], %8 {strides = array<i32>} : memref<16x32xbf16, #tpu.memory_space<vmem>>, vector<16x32xbf16>,
    %10 = vector.extract_strided_slice %7 {offsets = [0, 32], sizes = [16, 32], strides = [1, 1]} : vector<16x96xbf16> to vector<16x32xbf16>
    %c0_7 = arith.constant 0 : index
    %c0_8 = arith.constant 0 : index
    %11 = vector.load %arg5[%c0_7, %c0_8] : memref<16x32xbf16, #tpu.memory_space<vmem>>, vector<16x32xbf16>
    tpu.vector_store %arg5[%c0_7, %c0_8], %10 {strides = array<i32>} : memref<16x32xbf16, #tpu.memory_space<vmem>>, vector<16x32xbf16>,
    %12 = vector.extract_strided_slice %7 {offsets = [0, 64], sizes = [16, 32], strides = [1, 1]} : vector<16x96xbf16> to vector<16x32xbf16>
    %c0_9 = arith.constant 0 : index
    %c0_10 = arith.constant 0 : index
    %13 = vector.load %arg6[%c0_9, %c0_10] : memref<16x32xbf16, #tpu.memory_space<vmem>>, vector<16x32xbf16>
    tpu.vector_store %arg6[%c0_9, %c0_10], %12 {strides = array<i32>} : memref<16x32xbf16, #tpu.memory_space<vmem>>, vector<16x32xbf16>,
    return
  }
  func.func @transform_0(%arg0: i32) -> (i32, i32) {
    %c0_i32 = arith.constant 0 : i32
    %c0_i32_0 = arith.constant 0 : i32
    return %arg0, %c0_i32 : i32, i32
  }
  func.func @transform_1(%arg0: i32) -> (i32, i32) {
    %c0_i32 = arith.constant 0 : i32
    %c0_i32_0 = arith.constant 0 : i32
    %c0_i32_1 = arith.constant 0 : i32
    return %c0_i32, %c0_i32_0 : i32, i32
  }
  func.func @transform_2(%arg0: i32) -> (i32, i32) {
    %c0_i32 = arith.constant 0 : i32
    %c0_i32_0 = arith.constant 0 : i32
    %c0_i32_1 = arith.constant 0 : i32
    return %c0_i32, %c0_i32_0 : i32, i32
  }
  func.func @transform_3(%arg0: i32) -> (i32, i32) {
    %c0_i32 = arith.constant 0 : i32
    %c0_i32_0 = arith.constant 0 : i32
    return %arg0, %c0_i32 : i32, i32
  }
  func.func @transform_4(%arg0: i32) -> (i32, i32) {
    %c0_i32 = arith.constant 0 : i32
    %c0_i32_0 = arith.constant 0 : i32
    return %arg0, %c0_i32 : i32, i32
  }
  func.func @transform_5(%arg0: i32) -> (i32, i32) {
    %c0_i32 = arith.constant 0 : i32
    %c0_i32_0 = arith.constant 0 : i32
    return %arg0, %c0_i32 : i32, i32
  }
}

</mosaic_0001>

<bundles_post_ra>
// kernel: tpu_custom_call.1
= control target key start
LH: loop header
LB: loop body
LE: loop exit
PB: predicated region body
PF: predicated region fallthrough
CT: control target
= control target key end

     0   :  { %7 = vsyncpa [#allocation3], 0  ;;  %s700_s0 = inlined_call_operand.hbm [shape: f32[16,128], index: 0, kind: input, shape index: {}]   ;;  %s701_s1 = inlined_call_operand.hbm [shape: f32[16,128], index: 1, kind: input, shape index: {}]   ;;  %s702_s2 = inlined_call_operand.hbm [shape: f32[16,128], index: 2, kind: output, shape index: {}]  }
   0x1   :  { %9 = vsyncpa [#allocation3 + $0x1], 0 }
   0x2   :  { %10 = vsyncpa [#allocation6], 0 }
   0x3   :  { %11 = vsyncpa [#allocation4], 0 }
   0x4   :  { %13 = vsyncpa [#allocation4 + $0x1], 0  ;;  %s489_s9 = smov 0   ;;  %s491_s10 = smov 0  }
   0x5   :  { %s493_s11 = smov 0   ;;  %s495_s12 = smov 0  }
   0x6 LB: > { %s510_s13 = sadd.s32 4294967295, %s469_s12   ;;  %s270_s14 = sadd.s32 4294967294, %s469_s12   ;;  %s469_s12 = sphi %s495_s12, %s726_s12   ;;  %s465_s11 = sphi %s493_s11, %s725_s11   ;;  %s461_s10 = sphi %s491_s10, %s724_s10   ;;  %s457_s9 = sphi %s489_s9, %s723_s9  }
   0x7   : > { %p39_p0 = scmp.ne.s32.totalorder %s461_s10, %s457_s9  ;;  %p703_p1 = scmp.eq.s32.totalorder %s510_s13, 0 }
   0x8   : > { %p90_p3 = scmp.eq.s32.totalorder %s270_s14, 1  ;;  %p271_p5 = scmp.ge.s32.totalorder %s469_s12, 1 }
   0x9   : > { %p519_p4 = por %p703_p1, %p39_p0  ;;  %p97_p7 = scmp.lt.s32.totalorder %s469_s12, 3 }
   0xa   : > { %p524_p6 = por %p90_p3, %p39_p0  ;;  %s471_s18 = smov [#allocation5]  }
   0xb   : > { %s706_s15 = scalar_select %p519_p4, 1, 0 }
   0xc   : > { %s707_s16 = scalar_select %p524_p6, 1, 0 }
   0xd   : > { %p529_p8 = pnand %p271_p5, %p97_p7  ;;  %s110_s19 = sshll.u32 %s471_s18, 4  ;;  %s533_s19 = int_to_ptr.vmem [resolvable:$true] %s110_s19 }
   0xe   : > { %s539_s20 = sadd.s32 1, %s469_s12   ;;  %s26_s24 = sadd.s32 1, %s465_s11 }
   0xf   : > { %s708_s17 = scalar_select %p529_p8, 1, 0 }
  0x10   : > { %p292_p10 = pneg %p529_p8  ;;  %s23_s22 = ssub.s32 %s469_s12, %s539_s20 }
  0x11   : > { %p549_p12 = scmp.eq.s32.totalorder %s23_s22, 0  ;;  %s341_s27 = scalar_lea.hbm %s701_s1, 128 }
  0x12   : > { %p543_p11 = pnand %p292_p10, %p703_p1  ;;  %p342_p0 = scmp.ne.s32.totalorder %s701_s1, %s341_s27 }
  0x13   : > { %s710_s23 = scalar_select %p549_p12, 1, 0 }
  0x14   : > { %p343_p3 = pneg %p543_p11  ;;  %s346_s4 = scalar_lea.hbm %s701_s1, 256 }
  0x15   : > { %p347_p10 = scmp.lt.u32.totalorder %s346_s4, %s341_s27  ;;  %p348_p9 = scmp.lt.u32.totalorder %s341_s27, %s701_s1 }
  0x16   : > { %p344_p5 = pnand %p343_p3, %p342_p0 }
  0x17   : > { %p349_p1 = por %p348_p9, %p347_p10 }
  0x18   : > { %p345_p7 = pneg %p344_p5 }
  0x1a   : > { %p350_p2 = pnand %p349_p1, %p345_p7 }
  0x1c   : > { %353 = shalt.err (!%p350_p2)
}
  0x1d   : > { %s354_s7 = scalar_lea.vmem %s533_s19, 128  ;;  %p362_p5 = scmp.lt.s32.totalorder %s533_s19, %s533_s19 }
  0x1e   : > { %p355_p13 = scmp.ne.s32.totalorder %s533_s19, %s354_s7  ;;  %p363_p4 = scmp.lt.s32.totalorder %s354_s7, %s354_s7 }
  0x20   : > { %p357_p6 = pnand %p355_p13, %p343_p3  ;;  %p364_p8 = por %p363_p4, %p362_p5 }
  0x22   : > { %p358_p0 = pneg %p357_p6 }
  0x24   : > { %p365_p12 = pnand %p364_p8, %p358_p0 }
  0x26   : > { %368 = shalt.err (!%p365_p12)
}
  0x27   : > { %295 = dma.hbm_to_vmem [thread:$0]  (!%p543_p11), %s701_s1, 128, %s533_s19, [#allocation6]  }
  0x28   : > { %p711_p1 = scmp.ne.s32.totalorder %s710_s23, 0  ;;  %p34_p2 = scmp.eq.s32.totalorder %s469_s12, 0 }
  0x29   : > { %p712_p4 = scmp.ne.s32.totalorder %s465_s11, %s461_s10  ;;  %p713_p6 = scmp.eq.s32.totalorder %s510_s13, 1 }
  0x2a   : > { %s583_s18 = scalar_select %p711_p1, %s465_s11, %s26_s24  }
  0x2b   : > { %p591_p8 = por %p713_p6, %p712_p4  ;;  %p305_p9 = scmp.lt.s32.totalorder %s469_s12, 2 }
  0x2c   : > { %s121_s22 = sand.u32 1, %s465_s11   ;;  %p715_p12 = pmov %p712_p4 }
  0x2d   : > { %s274_s25 = sshll.u32 %s121_s22, 3  ;;  %s275_s26 = sshll.u32 %s469_s12, 7 }
  0x2e   : > { %p35_p13 = por %p34_p2, %p715_p12  ;;  %s604_s19 = scalar_lea.hbm %s700_s0, %s275_s26 }
  0x2f   : > { %s125_s23 = scalar_lea.vmem [#allocation2], %s274_s25  ;;  %s122_s30 = scalar_lea.sflag [#allocation3], %s121_s22 }
  0x30   : > { %s132_s24 = sshll.u32 %s125_s23, 4  ;;  %p606_p11 = pnand %p305_p9, %p35_p13  ;;  %s610_s24 = int_to_ptr.vmem [resolvable:$true] %s132_s24 }
  0x31   : > { %s369_s3 = scalar_lea.hbm %s604_s19, 128  ;;  %s374_s6 = scalar_lea.hbm %s700_s0, 256 }
  0x32   : > { %p370_p3 = scmp.ne.s32.totalorder %s604_s19, %s369_s3  ;;  %p371_p7 = pneg %p606_p11 }
  0x33   : > { %p375_p5 = scmp.lt.u32.totalorder %s604_s19, %s700_s0  ;;  %p376_p1 = scmp.lt.u32.totalorder %s374_s6, %s369_s3 }
  0x34   : > { %p372_p10 = pnand %p371_p7, %p370_p3  ;;  %p378_p4 = scmp.lt.u32.totalorder %s369_s3, %s604_s19 }
  0x35   : > { %p377_p2 = por %p376_p1, %p375_p5 }
  0x36   : > { %p373_p0 = pneg %p372_p10 }
  0x37   : > { %p379_p6 = por %p378_p4, %p377_p2 }
  0x39   : > { %p380_p9 = pnand %p379_p6, %p373_p0 }
  0x3b   : > { %383 = shalt.err (!%p380_p9)
}
  0x3c   : > { %s384_s14 = scalar_lea.vmem %s610_s24, 128  ;;  %s472_s22 = smov [#allocation2]  }
  0x3d   : > { %p385_p12 = scmp.ne.s32.totalorder %s610_s24, %s384_s14  ;;  %s389_s25 = sshll.u32 %s472_s22, 4  ;;  %s390_s25 = int_to_ptr.vmem [resolvable:$false] %s389_s25 }
  0x3e   : > { %s391_s26 = scalar_lea.vmem %s390_s25, 256  ;;  %p392_p10 = scmp.lt.s32.totalorder %s610_s24, %s390_s25 }
  0x3f   : > { %p387_p13 = pnand %p385_p12, %p371_p7  ;;  %p393_p5 = scmp.lt.s32.totalorder %s391_s26, %s384_s14 }
  0x41   : > { %p388_p3 = pneg %p387_p13  ;;  %p394_p1 = por %p393_p5, %p392_p10 }
  0x43   : > { %p395_p2 = pnand %p394_p1, %p388_p3 }
  0x45   : > { %398 = shalt.err (!%p395_p2)
}
  0x46   : > { %299 = dma.hbm_to_vmem [thread:$0]  (!%p606_p11), %s604_s19, 128, %s610_s24, %s122_s30  }
  0x47   : > { %p717_p0 = scmp.ne.s32.totalorder %s708_s17, 0 }
  0x48   : > { %s640_s27 = sand.u32 (!%p717_p0), 1, %s461_s10   ;;  %p718_p7 = scmp.ne.s32.totalorder (!%p717_p0), %s706_s15, 0 }
  0x49   : > { %141 = sbr.rel (%p717_p0) target bundleno = 109 (0x6d), region = 28  ;;  %s277_s28 = sshll.u32 (!%p717_p0), %s640_s27, 3 }
  0x4a   : > { %s144_s23 = scalar_lea.sflag (!%p717_p0), [#allocation3], %s640_s27  ;;  %s147_s3 = scalar_lea.vmem (!%p717_p0), [#allocation2], %s277_s28 }
  0x50   : > { %444 = dma.done.wait (%p718_p7), %s144_s23, 128  }
  0x51   : > { %446 = vsyncadd (%p718_p7), %s144_s23, 4294967168  ;;  %p719_p4 = scmp.eq.s32.totalorder %s510_s13, 0 }
  0x53   : > { %448 = dma.done.wait (%p719_p4), [#allocation6], 128   ;;  %p720_p11 = pmov %p719_p4 }
  0x54   : > { %s171_s17 = scalar_lea.vmem [#allocation7], %s277_s28  ;;  %s281_s24 = sshll.u32 %s510_s13, 7  ;;  %v172_v0 = vld [vmem:[%s147_s3] sm:$0xff]  ;;  %v173_v1 = vld [vmem:[#allocation5] sm:$0xff] }
  0x55   : > { %450 = vsyncadd (%p720_p11), [#allocation6], 4294967168  ;;  %s190_s19 = sshll.u32 %s171_s17, 4  ;;  %v174_v2 = vadd.f32 %v173_v1, %v172_v0  ;;  %s658_s30 = scalar_lea.hbm %s702_s2, %s281_s24  ;;  %s653_s19 = int_to_ptr.vmem [resolvable:$true] %s190_s19 }
  0x56   : > { %s177_s4 = scalar_lea.sflag [#allocation4], %s640_s27  ;;  %s399_s5 = scalar_lea.vmem %s653_s19, 128 }
  0x57   : > { %175 = vst [vmem:[%s171_s17] sm:$0xff] %v174_v2  ;;  %p400_p6 = scmp.ne.s32.totalorder %s653_s19, %s399_s5  ;;  %s473_s13 = smov [#allocation7]  }
  0x58   : > { %s403_s6 = sshll.u32 %s473_s13, 4  ;;  %s404_s6 = int_to_ptr.vmem [resolvable:$false] %s403_s6 }
  0x59   : > { %p401_p9 = pnand %p400_p6, %p591_p8  ;;  %s405_s7 = scalar_lea.vmem %s404_s6, 256 }
  0x5a   : > { %p406_p13 = scmp.lt.s32.totalorder %s653_s19, %s404_s6  ;;  %p407_p3 = scmp.lt.s32.totalorder %s405_s7, %s399_s5 }
  0x5b   : > { %p402_p12 = pneg %p401_p9 }
  0x5c   : > { %p408_p10 = por %p407_p3, %p406_p13 }
  0x5e   : > { %p409_p5 = pnand %p408_p10, %p402_p12 }
  0x60   : > { %412 = shalt.err (!%p409_p5)
}
  0x61   : > { %s413_s8 = scalar_lea.hbm %s658_s30, 128  ;;  %s417_s25 = scalar_lea.hbm %s702_s2, 256 }
  0x62   : > { %p414_p1 = scmp.ne.s32.totalorder %s658_s30, %s413_s8  ;;  %p418_p7 = scmp.lt.u32.totalorder %s658_s30, %s702_s2 }
  0x63   : > { %p419_p4 = scmp.lt.u32.totalorder %s417_s25, %s413_s8  ;;  %p421_p6 = scmp.lt.u32.totalorder %s413_s8, %s658_s30 }
  0x64   : > { %p415_p2 = pnand %p414_p1, %p591_p8 }
  0x65   : > { %p420_p11 = por %p419_p4, %p418_p7 }
  0x66   : > { %p416_p0 = pneg %p415_p2 }
  0x67   : > { %p422_p9 = por %p421_p6, %p420_p11 }
  0x69   : > { %p423_p12 = pnand %p422_p9, %p416_p0 }
  0x6b   : > { %426 = shalt.err (!%p423_p12)
}
  0x6c   : > { %290 = dma.vmem_to_hbm [thread:$0]  (%p591_p8), %s653_s19, 128, %s658_s30, %s177_s4  }
  0x6d PF: > { %s202_s28 = sand.u32 1, %s457_s9   ;;  %p721_p13 = scmp.ne.s32.totalorder %s707_s16, 0 }
  0x6e   : > { %p722_p3 = scmp.ge.s32.totalorder %s469_s12, 2  ;;  %s203_s23 = scalar_lea.sflag [#allocation4], %s202_s28 }
  0x70   : > { %p301_p10 = pnand %p722_p3, %p721_p13 }
  0x72   : > { %452 = dma.done.wait (!%p301_p10), %s203_s23, 128  }
  0x73   : > { %454 = vsyncadd (!%p301_p10), %s203_s23, 4294967168  ;;  %p16_p5 = scmp.ge.s32.totalorder %s539_s20, 4   ;;  %s723_s9 = smov %s461_s10 }
  0x74   : > { %s724_s10 = smov %s465_s11  ;;  %s725_s11 = smov %s583_s18 }
  0x75   : > { %s726_s12 = smov %s539_s20  ;;  %18 = sbr.rel (!%p16_p5) target bundleno = 6 (0x6), region = 77 }
  0x7c   :  { %208 = vsyncpa [#allocation3], 1 }
  0x7d   :  { %210 = vsyncpa [#allocation3 + $0x1], 1 }
  0x7e   :  { %211 = vsyncpa [#allocation6], 1 }
  0x7f   :  { %212 = vsyncpa [#allocation4], 1 }
  0x80   :  { %214 = vsyncpa [#allocation4 + $0x1], 1 }

// kernel: tpu_custom_call.1
= control target key start
LH: loop header
LB: loop body
LE: loop exit
PB: predicated region body
PF: predicated region fallthrough
CT: control target
= control target key end

     0   :  { %11 = vsyncpa [#allocation3], 0  ;;  %s522_s0 = inlined_call_operand.hbm [shape: f32[16,32], index: 0, kind: input, shape index: {}]   ;;  %s523_s1 = inlined_call_operand.hbm [shape: bf16[32,96], index: 1, kind: input, shape index: {}]   ;;  %s524_s2 = inlined_call_operand.hbm [shape: f32[1,96], index: 2, kind: input, shape index: {}]   ;;  %s525_s3 = inlined_call_operand.hbm [shape: bf16[16,32], index: 3, kind: output, shape index: {0}]   ;;  %s526_s4 = inlined_call_operand.hbm [shape: bf16[16,32], index: 4, kind: output, shape index: {1}]   ;;  %s527_s5 = inlined_call_operand.hbm [shape: bf16[16,32], index: 5, kind: output, shape index: {2}]  }
   0x1   :  { %12 = vsyncpa [#allocation6], 0 }
   0x2   :  { %13 = vsyncpa [#allocation4], 0 }
   0x3   :  { %14 = vsyncpa [#allocation10], 0  ;;  %s380_s18 = smov [#allocation5]   ;;  %s240_s22 = scalar_lea.hbm %s523_s1, 256 }
   0x4   :  { %s32_s19 = sshll.u32 %s380_s18, 4  ;;  %p241_p0 = scmp.ne.s32.totalorder %s523_s1, %s240_s22  ;;  %s33_s19 = int_to_ptr.vmem [resolvable:$true] %s32_s19 }
   0x5   :  { %p244_p1 = scmp.lt.u32.totalorder %s240_s22, %s523_s1 }
   0x7   :  { %p246_p2 = pnand %p244_p1, %p241_p0 }
   0x9   :  { %249 = shalt.err (!%p246_p2)
}
   0xa   :  { %s250_s27 = scalar_lea.vmem %s33_s19, 256  ;;  %p255_p4 = scmp.lt.s32.totalorder %s33_s19, %s33_s19 }
   0xb   :  { %p251_p3 = scmp.ne.s32.totalorder %s33_s19, %s250_s27  ;;  %p256_p5 = scmp.lt.s32.totalorder %s250_s27, %s250_s27 }
   0xd   :  { %p257_p6 = por %p256_p5, %p255_p4 }
   0xf   :  { %p258_p7 = pnand %p257_p6, %p251_p3 }
  0x11   :  { %261 = shalt.err (!%p258_p7)
}
  0x12   :  { %s381_s28 = smov 64   ;;  %s382_s29 = smov 4  }
  0x13   :  { %38 = dma.hbm_to_vmem [thread:$0]  %s523_s1, 256, %s33_s19, [#allocation6], %s381_s28, %s381_s28, %s382_s29  }
  0x14   :  { %s383_s7 = smov [#allocation2]   ;;  %s262_s11 = scalar_lea.hbm %s522_s0, 256 }
  0x15   :  { %s20_s8 = sshll.u32 %s383_s7, 4  ;;  %p263_p8 = scmp.ne.s32.totalorder %s522_s0, %s262_s11  ;;  %s21_s8 = int_to_ptr.vmem [resolvable:$true] %s20_s8 }
  0x16   :  { %p266_p9 = scmp.lt.u32.totalorder %s262_s11, %s522_s0 }
  0x18   :  { %p268_p10 = pnand %p266_p9, %p263_p8 }
  0x1a   :  { %271 = shalt.err (!%p268_p10)
}
  0x1b   :  { %s272_s16 = scalar_lea.vmem %s21_s8, 256  ;;  %p277_p12 = scmp.lt.s32.totalorder %s21_s8, %s21_s8 }
  0x1c   :  { %p273_p11 = scmp.ne.s32.totalorder %s21_s8, %s272_s16  ;;  %p278_p13 = scmp.lt.s32.totalorder %s272_s16, %s272_s16 }
  0x1e   :  { %p279_p0 = por %p278_p13, %p277_p12 }
  0x20   :  { %p280_p1 = pnand %p279_p0, %p273_p11 }
  0x22   :  { %283 = shalt.err (!%p280_p1)
}
  0x23   :  { %s384_s1 = smov 128   ;;  %s385_s17 = smov 8  }
  0x24   :  { %26 = dma.hbm_to_vmem [thread:$0]  %s522_s0, 256, %s21_s8, [#allocation3], %s384_s1, %s384_s1, %s385_s17  }
  0x25   :  { %s386_s20 = smov [#allocation7]   ;;  %s284_s24 = scalar_lea.hbm %s524_s2, 16 }
  0x26   :  { %s45_s21 = sshll.u32 %s386_s20, 4  ;;  %p285_p2 = scmp.ne.s32.totalorder %s524_s2, %s284_s24  ;;  %s46_s21 = int_to_ptr.vmem [resolvable:$true] %s45_s21 }
  0x27   :  { %p288_p3 = scmp.lt.u32.totalorder %s284_s24, %s524_s2 }
  0x29   :  { %p290_p4 = pnand %p288_p3, %p285_p2 }
  0x2b   :  { %293 = shalt.err (!%p290_p4)
}
  0x2c   :  { %s294_s6 = scalar_lea.vmem %s46_s21, 16  ;;  %s298_s0 = scalar_lea.vmem %s46_s21, 32 }
  0x2d   :  { %p295_p5 = scmp.ne.s32.totalorder %s46_s21, %s294_s6  ;;  %p299_p6 = scmp.lt.s32.totalorder %s46_s21, %s46_s21 }
  0x2e   :  { %p300_p7 = scmp.lt.s32.totalorder %s298_s0, %s294_s6 }
  0x30   :  { %p301_p8 = por %p300_p7, %p299_p6 }
  0x32   :  { %p302_p9 = pnand %p301_p8, %p295_p5 }
  0x34   :  { %305 = shalt.err (!%p302_p9)
}
  0x35   :  { %48 = dma.hbm_to_vmem [thread:$0]  %s524_s2, 16, %s46_s21, [#allocation6]  }
  0x36   :  { %372 = dma.done.wait [#allocation3], 256  }
  0x37   :  { %373 = vsyncadd [#allocation3], 4294967040 }
  0x38   :  { %374 = dma.done.wait [#allocation6], 272  }
  0x39   :  { %375 = vsyncadd [#allocation6], 4294967024  ;;  %v387_v0 = vmov 0.0   ;;  %vm388_vm0 = vmmov 0   ;;  %v238_v1 = vld [vmem:[#allocation5] sm:$0xff]   ;;  %v239_v2 = vld [vmem:[#allocation5 + $0x8] sm:$0xff]  }
  0x3a   :  { %217 = vmatprep.subr.bf16.mxu0 %v387_v0  ;;  %221 = vmatprep.mubr.msk.bf16.mxu0 %vm388_vm0, %v387_v0  ;;  %v59_v3 = vld [vmem:[#allocation2] sm:$0xff]  ;;  %v60_v4 = vld [vmem:[#allocation2 + $0x8] sm:$0xff]  ;;  %vm85_vm1 = vcmask 261120   ;;  %vm138_vm2 = vcmask 257024   ;;  %s389_s2 = smov [#allocation8]   ;;  %s390_s10 = smov 96  }
  0x3b   :  { %218 = vmatpush3.bf16.msra.mxu0 %v238_v1  ;;  %v61_v5 = vpack.c.bf16 %v60_v4, %v59_v3  ;;  %v206_v6 = vld [vmem:[#allocation7] ss:$0 sm:$0xff]  ;;  %s162_s9 = sshll.u32 %s389_s2, 4  ;;  %s163_s9 = int_to_ptr.vmem [resolvable:$true] %s162_s9 }
  0x3c   :  { %219 = vmatprep.subr.bf16.mxu0 %v387_v0  ;;  %s306_s11 = scalar_lea.vmem %s163_s9, 128  ;;  %p311_p11 = scmp.lt.s32.totalorder %s163_s9, %s163_s9 }
  0x3d   :  { %p307_p10 = scmp.ne.s32.totalorder %s163_s9, %s306_s11  ;;  %p312_p12 = scmp.lt.s32.totalorder %s306_s11, %s306_s11 }
  0x3f   :  { %220 = vmatpush3.bf16.msra.mxu0 %v239_v2  ;;  %p313_p13 = por %p312_p12, %p311_p11 }
  0x41   :  { %p314_p0 = pnand %p313_p13, %p307_p10 }
  0x42   :  { %222 = vmatmul.mubr.msk.bf16.vlgmr.msra.gmra.mrb[0].mxu0 %vm85_vm1, %v61_v5 }
 0x115   :  { %v123_v7 = vpop.f32.mrb[0].mxu0 }
 0x116   :  { %v124_v8 = vadd.f32 %v206_v6, %v123_v7  ;;  %v223_v9 = vpop.f32.mrb[1].mxu0 }
 0x117   :  { %v126_v10 = vpop.f32.mrb[2].mxu0 }
 0x118   :  { %v212_v11 = vpack.c.bf16 %v124_v8, %v124_v8  ;;  %v127_v12 = vadd.f32 %v206_v6, %v126_v10  ;;  %v224_v13 = vpop.f32.mrb[3].mxu0 }
 0x11a   :  { %v213_v14 = vpack.c.bf16 %v127_v12, %v127_v12  ;;  %149 = vrot.lane.b32.xlu1 %v212_v11, %s381_s28  ;;  %141 = vrot.lane.b32.xlu0 %v212_v11, %s390_s10  ;;  %139 = vst.msk [vmem:[#allocation8] sm:$0xf] %vm138_vm2, %v212_v11 }
 0x11c   :  { %140 = vst.msk [vmem:[#allocation8 + $0x4] sm:$0xf] %vm138_vm2, %v213_v14 }
 0x11d   :  { %317 = shalt.err (!%p314_p0)
}
 0x11e   :  { %s318_s14 = scalar_lea.hbm %s525_s3, 128 }
 0x11f   :  { %p319_p1 = scmp.ne.s32.totalorder %s525_s3, %s318_s14  ;;  %p322_p2 = scmp.lt.u32.totalorder %s318_s14, %s525_s3 }
 0x121   :  { %p324_p3 = pnand %p322_p2, %p319_p1 }
 0x123   :  { %327 = shalt.err (!%p324_p3)
}
 0x124   :  { %168 = dma.vmem_to_hbm [thread:$0]  %s163_s9, 128, %s525_s3, [#allocation4], %s381_s28, %s381_s28, %s382_s29  }
 0x125   :  { %151 = vrot.lane.b32.xlu1 %v213_v14, %s381_s28  ;;  %143 = vrot.lane.b32.xlu0 %v213_v14, %s390_s10  ;;  %s391_s20 = smov [#allocation9]   ;;  %s392_s22 = smov [#allocation11]  }
 0x126   :  { %s174_s21 = sshll.u32 %s391_s20, 4  ;;  %s186_s23 = sshll.u32 %s392_s22, 4  ;;  %s175_s21 = int_to_ptr.vmem [resolvable:$true] %s174_s21  ;;  %s483_s23 = int_to_ptr.vmem [resolvable:$true] %s186_s23 }
 0x127   :  { %s328_s3 = scalar_lea.vmem %s175_s21, 128  ;;  %p333_p5 = scmp.lt.s32.totalorder %s175_s21, %s175_s21 }
 0x128   :  { %p329_p4 = scmp.ne.s32.totalorder %s175_s21, %s328_s3  ;;  %p334_p6 = scmp.lt.s32.totalorder %s328_s3, %s328_s3 }
 0x12a   :  { %p335_p7 = por %p334_p6, %p333_p5 }
 0x12c   :  { %p336_p8 = pnand %p335_p7, %p329_p4 }
 0x18c   :  { %v150_v15 = vpop.permute.xlu1 %149  ;;  %v142_v16 = vpop.permute.xlu0 %141 }
 0x18d   :  { %155 = vst.msk [vmem:[#allocation11] sm:$0xf] %vm138_vm2, %v150_v15  ;;  %147 = vst.msk [vmem:[#allocation9] sm:$0xf] %vm138_vm2, %v142_v16 }
 0x197   :  { %v152_v17 = vpop.permute.xlu1 %151  ;;  %v144_v18 = vpop.permute.xlu0 %143 }
 0x198   :  { %156 = vst.msk [vmem:[#allocation11 + $0x4] sm:$0xf] %vm138_vm2, %v152_v17  ;;  %148 = vst.msk [vmem:[#allocation9 + $0x4] sm:$0xf] %vm138_vm2, %v144_v18 }
 0x199   :  { %339 = shalt.err (!%p336_p8)
}
 0x19a   :  { %s340_s26 = scalar_lea.hbm %s526_s4, 128 }
 0x19b   :  { %p341_p9 = scmp.ne.s32.totalorder %s526_s4, %s340_s26  ;;  %p344_p10 = scmp.lt.u32.totalorder %s340_s26, %s526_s4 }
 0x19d   :  { %p346_p11 = pnand %p344_p10, %p341_p9 }
 0x19f   :  { %349 = shalt.err (!%p346_p11)
}
 0x1a0   :  { %180 = dma.vmem_to_hbm [thread:$0]  %s175_s21, 128, %s526_s4, [#allocation10], %s381_s28, %s381_s28, %s382_s29  }
 0x1a1   :  { %s350_s2 = scalar_lea.vmem %s483_s23, 128  ;;  %p355_p13 = scmp.lt.s32.totalorder %s483_s23, %s483_s23 }
 0x1a2   :  { %p351_p12 = scmp.ne.s32.totalorder %s483_s23, %s350_s2  ;;  %p356_p0 = scmp.lt.s32.totalorder %s350_s2, %s350_s2 }
 0x1a4   :  { %p357_p1 = por %p356_p0, %p355_p13 }
 0x1a6   :  { %p358_p2 = pnand %p357_p1, %p351_p12 }
 0x1a8   :  { %361 = shalt.err (!%p358_p2)
}
 0x1a9   :  { %s362_s11 = scalar_lea.hbm %s527_s5, 128 }
 0x1aa   :  { %p363_p3 = scmp.ne.s32.totalorder %s527_s5, %s362_s11  ;;  %p366_p4 = scmp.lt.u32.totalorder %s362_s11, %s527_s5 }
 0x1ac   :  { %p368_p5 = pnand %p366_p4, %p363_p3 }
 0x1ae   :  { %371 = shalt.err (!%p368_p5)
}
 0x1af   :  { %192 = dma.vmem_to_hbm [thread:$0]  %s483_s23, 128, %s527_s5, [#allocation10], %s381_s28, %s381_s28, %s382_s29  }
 0x1b0   :  { %376 = dma.done.wait [#allocation4], 128  }
 0x1b1   :  { %377 = vsyncadd [#allocation4], 4294967168 }
 0x1b2   :  { %378 = dma.done.wait [#allocation10], 256  }
 0x1b3   :  { %379 = vsyncadd [#allocation10], 4294967040 }
 0x1b4   :  { %202 = vsyncpa [#allocation3], 1 }
 0x1b5   :  { %203 = vsyncpa [#allocation6], 1 }
 0x1b6   :  { %204 = vsyncpa [#allocation4], 1 }
 0x1b7   :  { %205 = vsyncpa [#allocation10], 1 }

</bundles_post_ra>
